<compile_context>
chip_gen: v7x
topology: tpu7x:2x2x1
jax: 0.10.0
libtpu: 0.0.40
codegen_flags: <defaults>
</compile_context>

<pallas_src>
import math
import functools

import jax
import jax.numpy as jnp
from jax import lax
from jax.experimental import pallas as pl
from jax.experimental.pallas import tpu as pltpu


NEG_INF = -1e30  # finite, f32 safe; avoids exp(-inf - -inf) = NaN


def _vmem_limit_bytes():
    """Half of physical VMEM, capped at 64 MiB (v5e/v6e: 64 MiB, v7x: 32 MiB)."""
    try:
        cap = pltpu.get_tpu_info().vmem_capacity_bytes
    except Exception:
        cap = 128 << 20
    return int(min(64 << 20, cap // 2))


def _pick_block(dim, cap, base):
    """Largest block <= cap that divides `dim` and is a multiple of `base`;
    falls back to the full dimension (always satisfies the (8,128) rule)."""
    if dim <= cap:
        return dim
    b = (cap // base) * base
    while b >= base:
        if dim % b == 0:
            return b
        b -= base
    return dim


# ----------------------------------------------------------------------------
# Tiled, pipelined matmul:  x (M, K) @ w_t (K, N) -> (M, N)   (bf16 MXU, f32 acc)
# ----------------------------------------------------------------------------
def _matmul_kernel(x_ref, w_ref, o_ref, acc_ref):
    @pl.when(pl.program_id(2) == 0)
    def _():
        acc_ref[...] = jnp.zeros_like(acc_ref)

    acc_ref[...] += jnp.dot(
        x_ref[...].astype(jnp.bfloat16),
        w_ref[...].astype(jnp.bfloat16),
        preferred_element_type=jnp.float32)

    @pl.when(pl.program_id(2) == pl.num_programs(2) - 1)
    def _():
        o_ref[...] = acc_ref[...].astype(o_ref.dtype)


def matmul(x, w_t, *, bm_cap=512, bn_cap=512, bk_cap=512):
    M, K = x.shape
    K2, N = w_t.shape
    assert K == K2
    bm = _pick_block(M, bm_cap, 8)
    bn = _pick_block(N, bn_cap, 128)
    bk = _pick_block(K, bk_cap, 128)
    grid = (M // bm, N // bn, K // bk)
    nbytes = jnp.dtype(x.dtype).itemsize
    cost = pl.CostEstimate(
        flops=int(2 * M * N * K),
        transcendentals=0,
        bytes_accessed=int((M * K * (N // bn) + K * N * (M // bm) + M * N) * nbytes),
    )
    return pl.pallas_call(
        _matmul_kernel,
        out_shape=jax.ShapeDtypeStruct((M, N), x.dtype),
        grid_spec=pltpu.PrefetchScalarGridSpec(
            num_scalar_prefetch=0,
            grid=grid,
            in_specs=[
                pl.BlockSpec((bm, bk), lambda i, j, k: (i, k)),
                pl.BlockSpec((bk, bn), lambda i, j, k: (k, j)),
            ],
            out_specs=pl.BlockSpec((bm, bn), lambda i, j, k: (i, j)),
            scratch_shapes=[pltpu.VMEM((bm, bn), jnp.float32)],
        ),
        compiler_params=pltpu.CompilerParams(
            dimension_semantics=("parallel", "parallel", "arbitrary"),
            vmem_limit_bytes=_vmem_limit_bytes(),
        ),
        cost_estimate=cost,
    )(x, w_t)


# ----------------------------------------------------------------------------
# RoPE + relayout prep kernel.
#   Reads Q/K/V column-blocks directly from the fused QKV slab (B, S, [Q|K|V]),
#   applies RoPE (and 1/sqrt(D) scale folded into Q), and writes
#     q: (B, NH,  S, D)     k: (B, NKV, S, D)     v: (B, NKV, S, D)
# ----------------------------------------------------------------------------
def _rope_prep_kernel(q_ref, k_ref, v_ref, cos_ref, sin_ref,
                      qo_ref, ko_ref, vo_ref, *, nh, nkv, head_dim, scale):
    half = head_dim // 2
    cos = cos_ref[...].astype(jnp.float32)[:, None, :]   # (bs, 1, D)
    sin = sin_ref[...].astype(jnp.float32)[:, None, :]

    def rope_heads(x_flat, n, sc):
        bs = x_flat.shape[0]
        x = x_flat.reshape(bs, n, head_dim).astype(jnp.float32) * sc
        rot = jnp.concatenate([-x[..., half:], x[..., :half]], axis=-1)
        return x * cos + rot * sin                        # (bs, n, D)

    q = rope_heads(q_ref[...], nh, scale)
    qo_ref[...] = q.transpose(1, 0, 2).astype(qo_ref.dtype)      # (nh, bs, D)

    k = rope_heads(k_ref[...], nkv, 1.0)
    ko_ref[...] = k.transpose(1, 0, 2).astype(ko_ref.dtype)      # (nkv, bs, D)

    bs = v_ref.shape[0]
    v = v_ref[...].reshape(bs, nkv, head_dim)
    vo_ref[...] = v.transpose(1, 0, 2).astype(vo_ref.dtype)      # (nkv, bs, D)


def rope_and_split(qkv3, cos, sin, *, num_heads, num_kv_heads, head_dim, scale):
    B, S, total = qkv3.shape
    q_sz = num_heads * head_dim
    kv_sz = num_kv_heads * head_dim
    assert total == q_sz + 2 * kv_sz and q_sz % kv_sz == 0
    n_rep = q_sz // kv_sz
    bs = _pick_block(S, 512, 8)
    dtype = qkv3.dtype

    if q_sz % 128 == 0 and kv_sz % 128 == 0:
        # Read Q/K/V column blocks straight from the fused slab (no XLA slices).
        q_in, k_in, v_in = qkv3, qkv3, qkv3
        q_idx, k_idx, v_idx = 0, n_rep, n_rep + 1
    else:
        # TODO(synk): lane-unaligned head groups fall back to XLA column slices.
        q_in = qkv3[..., :q_sz]
        k_in = qkv3[..., q_sz:q_sz + kv_sz]
        v_in = qkv3[..., q_sz + kv_sz:]
        q_idx = k_idx = v_idx = 0

    kernel = functools.partial(_rope_prep_kernel, nh=num_heads, nkv=num_kv_heads,
                               head_dim=head_dim, scale=scale)

    return pl.pallas_call(
        kernel,
        out_shape=(
            jax.ShapeDtypeStruct((B, num_heads, S, head_dim), dtype),
            jax.ShapeDtypeStruct((B, num_kv_heads, S, head_dim), dtype),
            jax.ShapeDtypeStruct((B, num_kv_heads, S, head_dim), dtype),
        ),
        grid_spec=pltpu.PrefetchScalarGridSpec(
            num_scalar_prefetch=0,
            grid=(B, S // bs),
            in_specs=[
                pl.BlockSpec((None, bs, q_sz), lambda b, s: (b, s, q_idx)),
                pl.BlockSpec((None, bs, kv_sz), lambda b, s: (b, s, k_idx)),
                pl.BlockSpec((None, bs, kv_sz), lambda b, s: (b, s, v_idx)),
                pl.BlockSpec((None, bs, head_dim), lambda b, s: (b, s, 0)),
                pl.BlockSpec((None, bs, head_dim), lambda b, s: (b, s, 0)),
            ],
            out_specs=[
                pl.BlockSpec((None, num_heads, bs, head_dim), lambda b, s: (b, 0, s, 0)),
                pl.BlockSpec((None, num_kv_heads, bs, head_dim), lambda b, s: (b, 0, s, 0)),
                pl.BlockSpec((None, num_kv_heads, bs, head_dim), lambda b, s: (b, 0, s, 0)),
            ],
        ),
        compiler_params=pltpu.CompilerParams(
            dimension_semantics=("parallel", "parallel"),
            vmem_limit_bytes=_vmem_limit_bytes(),
        ),
    )(q_in, k_in, v_in, cos, sin)


# ----------------------------------------------------------------------------
# Flash attention with GQA group stacking and in-kernel causal mask.
#   q: (B, NH, S, D)   (RoPE + 1/sqrt(D) already applied)
#   k: (B, NKV, S, D)  (RoPE already applied)
#   v: (B, NKV, S, D)
#   out: (B, S, NH*D)  lane-dense, consumed by o_proj with no transpose
# ----------------------------------------------------------------------------
def _flash_attn_kernel(q_ref, k_ref, v_ref, o_ref,
                       q_scr, m_ref, l_ref, acc_ref,
                       *, n_rep, head_dim, block_q, block_kv):
    qi = pl.program_id(2)
    ki = pl.program_id(3)
    nk = pl.num_programs(3)
    rows = n_rep * block_q

    @pl.when(ki == 0)
    def _():
        # Stack the GQA group's query heads once per q tile (hoisted out of kv loop).
        q_scr[...] = q_ref[...].reshape(rows, head_dim).astype(jnp.bfloat16)
        m_ref[...] = jnp.full_like(m_ref, NEG_INF)
        l_ref[...] = jnp.zeros_like(l_ref)
        acc_ref[...] = jnp.zeros_like(acc_ref)

    # Only blocks touching/below the causal diagonal do work (dead blocks also
    # issue no DMA thanks to the clamped K/V index_map).
    @pl.when(ki * block_kv < (qi + 1) * block_q)
    def _():
        k = k_ref[...].astype(jnp.bfloat16)          # (block_kv, D)
        v = v_ref[...].astype(jnp.bfloat16)

        # One stacked score matmul for the whole GQA group: (rows, D) x (D, bkv).
        s = lax.dot_general(q_scr[...], k, (((1,), (1,)), ((), ())),
                            preferred_element_type=jnp.float32)   # (rows, bkv)

        q_pos = qi * block_q + (
            lax.broadcasted_iota(jnp.int32, (rows, block_kv), 0) % block_q)
        k_pos = ki * block_kv + lax.broadcasted_iota(jnp.int32, (rows, block_kv), 1)
        s = jnp.where(k_pos <= q_pos, s, NEG_INF)

        m_prev = m_ref[...]
        m_new = jnp.maximum(m_prev, jnp.max(s, axis=-1, keepdims=True))
        alpha = jnp.exp(m_prev - m_new)
        p = jnp.exp(s - m_new)
        l_ref[...] = alpha * l_ref[...] + jnp.sum(p, axis=-1, keepdims=True)
        acc_ref[...] = alpha * acc_ref[...] + jnp.dot(
            p.astype(jnp.bfloat16), v, preferred_element_type=jnp.float32)
        m_ref[...] = m_new

    @pl.when(ki == nk - 1)
    def _():
        out = acc_ref[...] / l_ref[...]              # exact reciprocal at writeback
        out = out.reshape(n_rep, block_q, head_dim).transpose(1, 0, 2)
        o_ref[...] = out.reshape(block_q, n_rep * head_dim).astype(o_ref.dtype)


def flash_attention(q, k, v, *, n_rep, head_dim, block_cap=256):
    B, NH, S, D = q.shape
    _, NKV, _, _ = k.shape
    assert D == head_dim and NH == NKV * n_rep
    group_width = n_rep * head_dim
    if group_width % 128 != 0 and group_width != NH * head_dim:
        # TODO(synk): fall back to per-head output blocking when a GQA group is not lane-aligned.
        raise NotImplementedError("n_rep * head_dim must be a multiple of 128 (or == NH*D)")

    block_q = _pick_block(S, block_cap, 8)
    block_kv = _pick_block(S, block_cap, 8)
    grid = (B, NKV, S // block_q, S // block_kv)

    def kv_index_map(b, g, qi, ki):
        # Clamp to the diagonal block: causally-dead tiles repeat the previous
        # block index, so no DMA is issued for them.
        last_live = ((qi + 1) * block_q - 1) // block_kv
        return (b, g, jnp.minimum(ki, last_live), 0)

    kernel = functools.partial(_flash_attn_kernel, n_rep=n_rep, head_dim=head_dim,
                               block_q=block_q, block_kv=block_kv)

    nbytes = jnp.dtype(q.dtype).itemsize
    kv_rereads = max(1, S // (2 * block_q))
    cost = pl.CostEstimate(
        flops=int(2 * B * NH * S * S * head_dim),          # causal-discounted
        transcendentals=int(B * NH * S * S // 2),
        bytes_accessed=int((2 * q.size + (k.size + v.size) * kv_rereads) * nbytes),
    )

    return pl.pallas_call(
        kernel,
        out_shape=jax.ShapeDtypeStruct((B, S, NH * head_dim), q.dtype),
        grid_spec=pltpu.PrefetchScalarGridSpec(
            num_scalar_prefetch=0,
            grid=grid,
            in_specs=[
                pl.BlockSpec((None, n_rep, block_q, head_dim),
                             lambda b, g, qi, ki: (b, g, qi, 0)),
                pl.BlockSpec((None, None, block_kv, head_dim), kv_index_map),
                pl.BlockSpec((None, None, block_kv, head_dim), kv_index_map),
            ],
            out_specs=pl.BlockSpec((None, block_q, group_width),
                                   lambda b, g, qi, ki: (b, qi, g)),
            scratch_shapes=[
                pltpu.VMEM((n_rep * block_q, head_dim), jnp.bfloat16),   # stacked q
                pltpu.VMEM((n_rep * block_q, 1), jnp.float32),           # m
                pltpu.VMEM((n_rep * block_q, 1), jnp.float32),           # l
                pltpu.VMEM((n_rep * block_q, head_dim), jnp.float32),    # acc
            ],
        ),
        compiler_params=pltpu.CompilerParams(
            dimension_semantics=("parallel", "parallel", "parallel", "arbitrary"),
            vmem_limit_bytes=_vmem_limit_bytes(),
        ),
        cost_estimate=cost,
    )(q, k, v)


# ----------------------------------------------------------------------------
# Module wrapper
# ----------------------------------------------------------------------------
def make_params(key, hidden_size, num_heads, num_kv_heads, head_dim, dtype=jnp.float32):
    k1, k2, k3, k4 = jax.random.split(key, 4)
    scale = 0.02
    # stored pre-transposed: [in, out]  (nn.Linear weight is [out, in])
    wq_t = (scale * jax.random.normal(k1, (hidden_size, num_heads * head_dim))).astype(dtype)
    wk_t = (scale * jax.random.normal(k2, (hidden_size, num_kv_heads * head_dim))).astype(dtype)
    wv_t = (scale * jax.random.normal(k3, (hidden_size, num_kv_heads * head_dim))).astype(dtype)
    wo_t = (scale * jax.random.normal(k4, (num_heads * head_dim, hidden_size))).astype(dtype)
    return {"w_qkv_t": jnp.concatenate([wq_t, wk_t, wv_t], axis=1), "wo_t": wo_t}


def rotary_cos_sin(position_ids, head_dim, rope_theta, dtype):
    # Matches LlamaRotaryEmbedding (default rope_type, attention_scaling = 1.0)
    inv_freq = 1.0 / (
        rope_theta ** (jnp.arange(0, head_dim, 2, dtype=jnp.float32) / head_dim))
    freqs = position_ids.astype(jnp.float32)[:, :, None] * inv_freq[None, None, :]
    emb = jnp.concatenate([freqs, freqs], axis=-1)       # (B, S, D)
    return jnp.cos(emb).astype(dtype), jnp.sin(emb).astype(dtype)


def llama_attention_forward(hidden_states, params, position_ids, *,
                            num_heads, num_kv_heads, head_dim):
    B, S, H = hidden_states.shape
    n_rep = num_heads // num_kv_heads
    q_sz = num_heads * head_dim
    kv_sz = num_kv_heads * head_dim

    x2d = hidden_states.reshape(B * S, H)
    qkv = matmul(x2d, params["w_qkv_t"])                       # fused Q/K/V projection
    qkv3 = qkv.reshape(B, S, q_sz + 2 * kv_sz)

    cos, sin = rotary_cos_sin(position_ids, head_dim, rope_theta=10000.0,
                              dtype=hidden_states.dtype)

    q, k, v = rope_and_split(qkv3, cos, sin, num_heads=num_heads,
                             num_kv_heads=num_kv_heads, head_dim=head_dim,
                             scale=1.0 / math.sqrt(head_dim))

    attn = flash_attention(q, k, v, n_rep=n_rep, head_dim=head_dim)   # (B, S, NH*D)

    out = matmul(attn.reshape(B * S, q_sz), params["wo_t"]).reshape(B, S, H)
    return out


# ----------------------------------------------------------------------------
# Pure-JAX reference (for correctness check)
# ----------------------------------------------------------------------------
def reference_forward(hidden_states, params, position_ids, *,
                      num_heads, num_kv_heads, head_dim):
    B, S, H = hidden_states.shape
    n_rep = num_heads // num_kv_heads
    q_sz = num_heads * head_dim
    kv_sz = num_kv_heads * head_dim
    w = params["w_qkv_t"]
    wq_t, wk_t, wv_t = w[:, :q_sz], w[:, q_sz:q_sz + kv_sz], w[:, q_sz + kv_sz:]

    q = (hidden_states @ wq_t).reshape(B, S, num_heads, head_dim).transpose(0, 2, 1, 3)
    k = (hidden_states @ wk_t).reshape(B, S, num_kv_heads, head_dim).transpose(0, 2, 1, 3)
    v = (hidden_states @ wv_t).reshape(B, S, num_kv_heads, head_dim).transpose(0, 2, 1, 3)

    cos, sin = rotary_cos_sin(position_ids, head_dim, 10000.0, hidden_states.dtype)
    cos = cos[:, None]
    sin = sin[:, None]

    def rot_half(x):
        x1, x2 = x[..., : head_dim // 2], x[..., head_dim // 2:]
        return jnp.concatenate([-x2, x1], axis=-1)

    q = q * cos + rot_half(q) * sin
    k = k * cos + rot_half(k) * sin
    k = jnp.repeat(k, n_rep, axis=1)
    v = jnp.repeat(v, n_rep, axis=1)

    i = jnp.arange(S)[:, None]
    j = jnp.arange(S)[None, :]
    mask = jnp.where(j <= i, 0.0, jnp.finfo(jnp.float32).min)[None, None]

    s = jnp.einsum("bhqd,bhkd->bhqk", q, k) / math.sqrt(head_dim)
    s = s + mask
    p = jax.nn.softmax(s.astype(jnp.float32), axis=-1).astype(hidden_states.dtype)
    o = jnp.einsum("bhqk,bhkd->bhqd", p, v)
    o = o.transpose(0, 2, 1, 3).reshape(B, S, num_heads * head_dim)
    return o @ params["wo_t"]


# ----------------------------------------------------------------------------
if __name__ == "__main__":
    # small synthetic Llama-ish config
    B, S = 2, 8
    hidden_size = 256
    num_heads = 4
    num_kv_heads = 2   # GQA: num_key_value_groups = 2  ->  n_rep*D = 128 lanes
    head_dim = hidden_size // num_heads  # 64

    key = jax.random.PRNGKey(0)
    kx, kp = jax.random.split(key)
    hidden_states = jax.random.normal(kx, (B, S, hidden_size), dtype=jnp.float32)
    position_ids = jnp.broadcast_to(jnp.arange(S, dtype=jnp.int32)[None], (B, S))
    params = make_params(kp, hidden_size, num_heads, num_kv_heads, head_dim)

    out = llama_attention_forward(
        hidden_states, params, position_ids,
        num_heads=num_heads, num_kv_heads=num_kv_heads, head_dim=head_dim)
    out = jax.block_until_ready(out)

    ref = reference_forward(
        hidden_states, params, position_ids,
        num_heads=num_heads, num_kv_heads=num_kv_heads, head_dim=head_dim)
    ref = jax.block_until_ready(ref)

    assert out.shape == (B, S, hidden_size)
    assert bool(jnp.all(jnp.isfinite(out)))
    # bf16 MXU in the kernel vs f32 reference -> slightly looser tolerance
    assert bool(jnp.allclose(out, ref, atol=2e-2, rtol=2e-2)), "mismatch vs reference"

    # TODO(synk): KV-cache update path (past_key_value), output_attentions and
    # attention dropout are not implemented; this covers the stateless causal
    # eval forward pass only.
    print("KERNEL_OK")
</pallas_src>

<mosaic_0001>
module attributes {stable_mosaic.version = 11 : i64} {
  func.func @_matmul_kernel(%arg0: i32, %arg1: i32, %arg2: i32, %arg3: memref<16x256xf32, #tpu.memory_space<vmem>>, %arg4: memref<256x512xf32, #tpu.memory_space<vmem>>, %arg5: memref<16x512xf32, #tpu.memory_space<vmem>>, %arg6: memref<16x512xf32, #tpu.memory_space<vmem>>) attributes {dimension_semantics = [#tpu.dimension_semantics<parallel>, #tpu.dimension_semantics<parallel>, #tpu.dimension_semantics<arbitrary>], iteration_bounds = array<i64: 1, 1, 1>, scalar_prefetch = 0 : i64, scratch_operands = 1 : i64, tpu.core_type = #tpu.core_type<tc>, window_params = [{transform_indices = @transform_0, window_bounds = array<i64: 16, 256>}, {transform_indices = @transform_1, window_bounds = array<i64: 256, 512>}, {transform_indices = @transform_2, window_bounds = array<i64: 16, 512>}]} {
    %c0_i32 = arith.constant 0 : i32
    %0 = arith.cmpi eq, %arg2, %c0_i32 : i32
    %1 = arith.extui %0 : i1 to i32
    %c0_i32_0 = arith.constant 0 : i32
    %2 = arith.cmpi ne, %1, %c0_i32_0 : i32
    scf.if %2 {
      %cst_10 = arith.constant 0.000000e+00 : f32
      %14 = vector.broadcast %cst_10 : f32 to vector<16x512xf32>
      %c0_11 = arith.constant 0 : index
      %c0_12 = arith.constant 0 : index
      %15 = vector.load %arg6[%c0_11, %c0_12] : memref<16x512xf32, #tpu.memory_space<vmem>>, vector<16x512xf32>
      tpu.vector_store %arg6[%c0_11, %c0_12], %14 {strides = array<i32>} : memref<16x512xf32, #tpu.memory_space<vmem>>, vector<16x512xf32>,
    } else {
    }
    %c0 = arith.constant 0 : index
    %c0_1 = arith.constant 0 : index
    %3 = vector.load %arg6[%c0, %c0_1] : memref<16x512xf32, #tpu.memory_space<vmem>>, vector<16x512xf32>
    %c0_2 = arith.constant 0 : index
    %c0_3 = arith.constant 0 : index
    %4 = vector.load %arg3[%c0_2, %c0_3] : memref<16x256xf32, #tpu.memory_space<vmem>>, vector<16x256xf32>
    %5 = arith.truncf %4 : vector<16x256xf32> to vector<16x256xbf16>
    %c0_4 = arith.constant 0 : index
    %c0_5 = arith.constant 0 : index
    %6 = vector.load %arg4[%c0_4, %c0_5] : memref<256x512xf32, #tpu.memory_space<vmem>>, vector<256x512xf32>
    %7 = arith.truncf %6 : vector<256x512xf32> to vector<256x512xbf16>
    %cst = arith.constant dense<0.000000e+00> : vector<16x512xf32>
    %8 = tpu.matmul %5, %7, %cst {dimension_numbers = #tpu.dot_dimension_numbers<[1], [0], [0], [1], [0, 0, 1, 1], [], []>} : vector<16x256xbf16>, vector<256x512xbf16>, vector<16x512xf32> -> vector<16x512xf32>
    %9 = arith.addf %3, %8 : vector<16x512xf32>
    %c0_6 = arith.constant 0 : index
    %c0_7 = arith.constant 0 : index
    %10 = vector.load %arg6[%c0_6, %c0_7] : memref<16x512xf32, #tpu.memory_space<vmem>>, vector<16x512xf32>
    tpu.vector_store %arg6[%c0_6, %c0_7], %9 {strides = array<i32>} : memref<16x512xf32, #tpu.memory_space<vmem>>, vector<16x512xf32>,
    %c0_i32_8 = arith.constant 0 : i32
    %11 = arith.cmpi eq, %arg2, %c0_i32_8 : i32
    %12 = arith.extui %11 : i1 to i32
    %c0_i32_9 = arith.constant 0 : i32
    %13 = arith.cmpi ne, %12, %c0_i32_9 : i32
    scf.if %13 {
      %c0_10 = arith.constant 0 : index
      %c0_11 = arith.constant 0 : index
      %14 = vector.load %arg6[%c0_10, %c0_11] : memref<16x512xf32, #tpu.memory_space<vmem>>, vector<16x512xf32>
      %c0_12 = arith.constant 0 : index
      %c0_13 = arith.constant 0 : index
      %15 = vector.load %arg5[%c0_12, %c0_13] : memref<16x512xf32, #tpu.memory_space<vmem>>, vector<16x512xf32>
      tpu.vector_store %arg5[%c0_12, %c0_13], %14 {strides = array<i32>} : memref<16x512xf32, #tpu.memory_space<vmem>>, vector<16x512xf32>,
    } else {
    }
    return
  }
  func.func @transform_0(%arg0: i32, %arg1: i32, %arg2: i32) -> (i32, i32) {
    %c0_i32 = arith.constant 0 : i32
    return %arg0, %arg2 : i32, i32
  }
  func.func @transform_1(%arg0: i32, %arg1: i32, %arg2: i32) -> (i32, i32) {
    %c0_i32 = arith.constant 0 : i32
    return %arg2, %arg1 : i32, i32
  }
  func.func @transform_2(%arg0: i32, %arg1: i32, %arg2: i32) -> (i32, i32) {
    %c0_i32 = arith.constant 0 : i32
    return %arg0, %arg1 : i32, i32
  }
}

</mosaic_0001>

<bundles_post_ra>
// kernel: tpu_custom_call.1
= control target key start
LH: loop header
LB: loop body
LE: loop exit
PB: predicated region body
PF: predicated region fallthrough
CT: control target
= control target key end

     0   :  { %7 = vsyncpa [#allocation4], 0  ;;  %s540_s0 = inlined_call_operand.hbm [shape: f32[16,256], index: 0, kind: input, shape index: {}]   ;;  %s541_s1 = inlined_call_operand.hbm [shape: f32[256,512], index: 1, kind: input, shape index: {}]   ;;  %s542_s2 = inlined_call_operand.hbm [shape: f32[16,512], index: 2, kind: output, shape index: {}]  }
   0x1   :  { %8 = vsyncpa [#allocation7], 0 }
   0x2   :  { %9 = vsyncpa [#allocation5], 0  ;;  %s476_s9 = smov [#allocation3]   ;;  %s404_s13 = scalar_lea.hbm %s540_s0, 512 }
   0x3   :  { %s15_s10 = sshll.u32 %s476_s9, 4  ;;  %p405_p0 = scmp.ne.s32.totalorder %s540_s0, %s404_s13  ;;  %s16_s10 = int_to_ptr.vmem [resolvable:$true] %s15_s10 }
   0x4   :  { %p408_p1 = scmp.lt.u32.totalorder %s404_s13, %s540_s0 }
   0x6   :  { %p410_p2 = pnand %p408_p1, %p405_p0 }
   0x8   :  { %413 = shalt.err (!%p410_p2)
}
   0x9   :  { %s414_s18 = scalar_lea.vmem %s16_s10, 512  ;;  %p419_p4 = scmp.lt.s32.totalorder %s16_s10, %s16_s10 }
   0xa   :  { %p415_p3 = scmp.ne.s32.totalorder %s16_s10, %s414_s18  ;;  %p420_p5 = scmp.lt.s32.totalorder %s414_s18, %s414_s18 }
   0xc   :  { %p421_p6 = por %p420_p5, %p419_p4 }
   0xe   :  { %p422_p7 = pnand %p421_p6, %p415_p3 }
  0x10   :  { %425 = shalt.err (!%p422_p7)
}
  0x11   :  { %s477_s19 = smov 256   ;;  %s478_s20 = smov 16  }
  0x12   :  { %21 = dma.hbm_to_vmem [thread:$0]  %s540_s0, 512, %s16_s10, [#allocation4], %s477_s19, %s477_s19, %s478_s20  }
  0x13   :  { %s479_s23 = smov [#allocation6]   ;;  %s426_s27 = scalar_lea.hbm %s541_s1, 16384 }
  0x14   :  { %s27_s24 = sshll.u32 %s479_s23, 4  ;;  %p427_p8 = scmp.ne.s32.totalorder %s541_s1, %s426_s27  ;;  %s28_s24 = int_to_ptr.vmem [resolvable:$true] %s27_s24 }
  0x15   :  { %p430_p9 = scmp.lt.u32.totalorder %s426_s27, %s541_s1 }
  0x17   :  { %p432_p10 = pnand %p430_p9, %p427_p8 }
  0x19   :  { %435 = shalt.err (!%p432_p10)
}
  0x1a   :  { %s436_s4 = scalar_lea.vmem %s28_s24, 16384  ;;  %p441_p12 = scmp.lt.s32.totalorder %s28_s24, %s28_s24 }
  0x1b   :  { %p437_p11 = scmp.ne.s32.totalorder %s28_s24, %s436_s4  ;;  %p442_p13 = scmp.lt.s32.totalorder %s436_s4, %s436_s4 }
  0x1d   :  { %p443_p0 = por %p442_p13, %p441_p12 }
  0x1f   :  { %p444_p1 = pnand %p443_p0, %p437_p11 }
  0x21   :  { %447 = shalt.err (!%p444_p1)
}
  0x22   :  { %s480_s0 = smov 512   ;;  %s481_s5 = smov 32  }
  0x23   :  { %33 = dma.hbm_to_vmem [thread:$0]  %s541_s1, 16384, %s28_s24, [#allocation7], %s480_s0, %s480_s0, %s481_s5  }
  0x24   :  { %470 = dma.done.wait [#allocation4], 512  }
  0x25   :  { %471 = vsyncadd [#allocation4], 4294966784 }
  0x26   :  { %472 = dma.done.wait [#allocation7], 16384  }
  0x27   :  { %473 = vsyncadd [#allocation7], 4294950912  ;;  %v67_v0 = vld [vmem:[#allocation6 + $0x8] sm:$0xff]  ;;  %v69_v2 = vld [vmem:[#allocation6 + $0x18] sm:$0xff]  ;;  %s482_s1 = smov [#allocation8]  }
  0x28   :  { %v71_v1 = vld [vmem:[#allocation6 + $0x28] sm:$0xff]  ;;  %v73_v4 = vld [vmem:[#allocation6 + $0x38] sm:$0xff]  ;;  %v66_v5 = vld [vmem:[#allocation6] sm:$0xff]  ;;  %s384_s8 = sshll.u32 %s482_s1, 4  ;;  %s385_s8 = int_to_ptr.vmem [resolvable:$true] %s384_s8 }
  0x29   :  { %v195_v3 = vpack.c.bf16 %v71_v1, %v67_v0  ;;  %v70_v6 = vld [vmem:[#allocation6 + $0x20] sm:$0xff]  ;;  %v197_v7 = vpack.c.bf16 %v73_v4, %v69_v2  ;;  %v68_v9 = vld [vmem:[#allocation6 + $0x10] sm:$0xff]  ;;  %v75_v11 = vld [vmem:[#allocation6 + $0x48] sm:$0xff]  ;;  %s448_s9 = scalar_lea.vmem %s385_s8, 1024  ;;  %p453_p3 = scmp.lt.s32.totalorder %s385_s8, %s385_s8 }
  0x2a   :  { %v194_v8 = vpack.c.bf16 %v70_v6, %v66_v5  ;;  %v72_v10 = vld [vmem:[#allocation6 + $0x30] sm:$0xff]  ;;  %v79_v13 = vld [vmem:[#allocation6 + $0x68] sm:$0xff]  ;;  %v77_v14 = vld [vmem:[#allocation6 + $0x58] sm:$0xff]  ;;  %p449_p2 = scmp.ne.s32.totalorder %s385_s8, %s448_s9  ;;  %p454_p4 = scmp.lt.s32.totalorder %s448_s9, %s448_s9 }
  0x2b   :  { %258 = vmatprep.subr.bf16.mxu0 %v195_v3  ;;  %v196_v12 = vpack.c.bf16 %v72_v10, %v68_v9  ;;  %v81_v15 = vld [vmem:[#allocation6 + $0x78] sm:$0xff]  ;;  %301 = vmatprep.subr.bf16.mxu1 %v197_v7  ;;  %v199_v16 = vpack.c.bf16 %v79_v13, %v75_v11  ;;  %v74_v18 = vld [vmem:[#allocation6 + $0x40] sm:$0xff]  ;;  %v76_v20 = vld [vmem:[#allocation6 + $0x50] sm:$0xff] }
  0x2c   :  { %259 = vmatpush1.bf16.msra.mxu0 %v194_v8  ;;  %v201_v17 = vpack.c.bf16 %v81_v15, %v77_v14  ;;  %v78_v19 = vld [vmem:[#allocation6 + $0x60] sm:$0xff]  ;;  %v80_v22 = vld [vmem:[#allocation6 + $0x70] sm:$0xff]  ;;  %v83_v23 = vld [vmem:[#allocation6 + $0x88] sm:$0xff]  ;;  %p455_p5 = por %p454_p4, %p453_p3 }
  0x2d   :  { %302 = vmatpush1.bf16.msra.mxu1 %v196_v12  ;;  %v198_v21 = vpack.c.bf16 %v78_v19, %v74_v18  ;;  %v87_v24 = vld [vmem:[#allocation6 + $0xa8] sm:$0xff]  ;;  %260 = vmatprep.subr.bf16.mxu0 %v199_v16  ;;  %v200_v25 = vpack.c.bf16 %v80_v22, %v76_v20  ;;  %v85_v27 = vld [vmem:[#allocation6 + $0x98] sm:$0xff]  ;;  %v82_v29 = vld [vmem:[#allocation6 + $0x80] sm:$0xff] }
  0x2e   :  { %303 = vmatprep.subr.bf16.mxu1 %v201_v17  ;;  %v203_v26 = vpack.c.bf16 %v87_v24, %v83_v23  ;;  %v89_v28 = vld [vmem:[#allocation6 + $0xb8] sm:$0xff]  ;;  %v86_v31 = vld [vmem:[#allocation6 + $0xa0] sm:$0xff]  ;;  %v84_v32 = vld [vmem:[#allocation6 + $0x90] sm:$0xff]  ;;  %p456_p6 = pnand %p455_p5, %p449_p2 }
  0x2f   :  { %v205_v30 = vpack.c.bf16 %v89_v28, %v85_v27  ;;  %v88_v33 = vld [vmem:[#allocation6 + $0xb0] sm:$0xff]  ;;  %v202_v34 = vpack.c.bf16 %v86_v31, %v82_v29  ;;  %v91_v35 = vld [vmem:[#allocation6 + $0xc8] sm:$0xff]  ;;  %v93_v37 = vld [vmem:[#allocation6 + $0xd8] sm:$0xff] }
  0x30   :  { %261 = vmatpush1.bf16.msra.mxu0 %v198_v21  ;;  %v95_v36 = vld [vmem:[#allocation6 + $0xe8] sm:$0xff]  ;;  %v204_v38 = vpack.c.bf16 %v88_v33, %v84_v32  ;;  %v97_v40 = vld [vmem:[#allocation6 + $0xf8] sm:$0xff]  ;;  %v90_v41 = vld [vmem:[#allocation6 + $0xc0] sm:$0xff] }
  0x31   :  { %304 = vmatpush1.bf16.msra.mxu1 %v200_v25  ;;  %262 = vmatprep.subr.bf16.mxu0 %v203_v26  ;;  %v207_v39 = vpack.c.bf16 %v95_v36, %v91_v35  ;;  %v94_v42 = vld [vmem:[#allocation6 + $0xe0] sm:$0xff]  ;;  %v209_v43 = vpack.c.bf16 %v97_v40, %v93_v37  ;;  %v92_v44 = vld [vmem:[#allocation6 + $0xd0] sm:$0xff]  ;;  %v99_v46 = vld [vmem:[#allocation6 + $0x108] sm:$0xff] }
  0x32   :  { %305 = vmatprep.subr.bf16.mxu1 %v205_v30  ;;  %v96_v45 = vld [vmem:[#allocation6 + $0xf0] sm:$0xff]  ;;  %v103_v47 = vld [vmem:[#allocation6 + $0x128] sm:$0xff]  ;;  %v101_v48 = vld [vmem:[#allocation6 + $0x118] sm:$0xff]  ;;  %v206_v50 = vpack.c.bf16 %v94_v42, %v90_v41 }
  0x33   :  { %v105_v49 = vld [vmem:[#allocation6 + $0x138] sm:$0xff]  ;;  %v208_v51 = vpack.c.bf16 %v96_v45, %v92_v44  ;;  %v211_v52 = vpack.c.bf16 %v103_v47, %v99_v46  ;;  %v98_v53 = vld [vmem:[#allocation6 + $0x100] sm:$0xff]  ;;  %v100_v55 = vld [vmem:[#allocation6 + $0x110] sm:$0xff] }
  0x34   :  { %263 = vmatpush1.bf16.msra.mxu0 %v202_v34  ;;  %v102_v54 = vld [vmem:[#allocation6 + $0x120] sm:$0xff]  ;;  %v213_v56 = vpack.c.bf16 %v105_v49, %v101_v48  ;;  %v104_v57 = vld [vmem:[#allocation6 + $0x130] sm:$0xff]  ;;  %v107_v58 = vld [vmem:[#allocation6 + $0x148] sm:$0xff] }
  0x35   :  { %306 = vmatpush1.bf16.msra.mxu1 %v204_v38  ;;  %264 = vmatprep.subr.bf16.mxu0 %v207_v39  ;;  %v111_v59 = vld [vmem:[#allocation6 + $0x168] sm:$0xff]  ;;  %v109_v60 = vld [vmem:[#allocation6 + $0x158] sm:$0xff]  ;;  %v210_v62 = vpack.c.bf16 %v102_v54, %v98_v53  ;;  %v212_v63 = vpack.c.bf16 %v104_v57, %v100_v55  ;;  %v106_v1 = vld [vmem:[#allocation6 + $0x140] sm:$0xff] }
  0x36   :  { %307 = vmatprep.subr.bf16.mxu1 %v209_v43  ;;  %v113_v61 = vld [vmem:[#allocation6 + $0x178] sm:$0xff]  ;;  %v215_v0 = vpack.c.bf16 %v111_v59, %v107_v58  ;;  %v110_v2 = vld [vmem:[#allocation6 + $0x160] sm:$0xff]  ;;  %v108_v3 = vld [vmem:[#allocation6 + $0x150] sm:$0xff] }
  0x37   :  { %v217_v4 = vpack.c.bf16 %v113_v61, %v109_v60  ;;  %v112_v5 = vld [vmem:[#allocation6 + $0x170] sm:$0xff]  ;;  %v115_v6 = vld [vmem:[#allocation6 + $0x188] sm:$0xff]  ;;  %v117_v8 = vld [vmem:[#allocation6 + $0x198] sm:$0xff]  ;;  %v214_v10 = vpack.c.bf16 %v110_v2, %v106_v1 }
  0x38   :  { %265 = vmatpush1.bf16.msra.mxu0 %v206_v50  ;;  %v119_v7 = vld [vmem:[#allocation6 + $0x1a8] sm:$0xff]  ;;  %v121_v9 = vld [vmem:[#allocation6 + $0x1b8] sm:$0xff]  ;;  %v216_v11 = vpack.c.bf16 %v112_v5, %v108_v3  ;;  %v114_v13 = vld [vmem:[#allocation6 + $0x180] sm:$0xff] }
  0x39   :  { %308 = vmatpush1.bf16.msra.mxu1 %v208_v51  ;;  %266 = vmatprep.subr.bf16.mxu0 %v211_v52  ;;  %v219_v12 = vpack.c.bf16 %v119_v7, %v115_v6  ;;  %v118_v14 = vld [vmem:[#allocation6 + $0x1a0] sm:$0xff]  ;;  %v116_v15 = vld [vmem:[#allocation6 + $0x190] sm:$0xff]  ;;  %v221_v16 = vpack.c.bf16 %v121_v9, %v117_v8  ;;  %v123_v18 = vld [vmem:[#allocation6 + $0x1c8] sm:$0xff] }
  0x3a   :  { %309 = vmatprep.subr.bf16.mxu1 %v213_v56  ;;  %v120_v17 = vld [vmem:[#allocation6 + $0x1b0] sm:$0xff]  ;;  %v127_v19 = vld [vmem:[#allocation6 + $0x1e8] sm:$0xff]  ;;  %v125_v20 = vld [vmem:[#allocation6 + $0x1d8] sm:$0xff]  ;;  %v218_v22 = vpack.c.bf16 %v118_v14, %v114_v13 }
  0x3b   :  { %v129_v21 = vld [vmem:[#allocation6 + $0x1f8] sm:$0xff]  ;;  %v220_v23 = vpack.c.bf16 %v120_v17, %v116_v15  ;;  %v223_v24 = vpack.c.bf16 %v127_v19, %v123_v18  ;;  %v122_v25 = vld [vmem:[#allocation6 + $0x1c0] sm:$0xff]  ;;  %v124_v27 = vld [vmem:[#allocation6 + $0x1d0] sm:$0xff] }
  0x3c   :  { %267 = vmatpush1.bf16.msra.mxu0 %v210_v62  ;;  %v126_v26 = vld [vmem:[#allocation6 + $0x1e0] sm:$0xff]  ;;  %v225_v28 = vpack.c.bf16 %v129_v21, %v125_v20  ;;  %v128_v29 = vld [vmem:[#allocation6 + $0x1f0] sm:$0xff]  ;;  %v131_v30 = vld [vmem:[#allocation6 + $0x208] sm:$0xff] }
  0x3d   :  { %310 = vmatpush1.bf16.msra.mxu1 %v212_v63  ;;  %268 = vmatprep.subr.bf16.mxu0 %v215_v0  ;;  %v135_v31 = vld [vmem:[#allocation6 + $0x228] sm:$0xff]  ;;  %v133_v32 = vld [vmem:[#allocation6 + $0x218] sm:$0xff]  ;;  %v222_v34 = vpack.c.bf16 %v126_v26, %v122_v25  ;;  %v224_v35 = vpack.c.bf16 %v128_v29, %v124_v27  ;;  %v130_v37 = vld [vmem:[#allocation6 + $0x200] sm:$0xff] }
  0x3e   :  { %311 = vmatprep.subr.bf16.mxu1 %v217_v4  ;;  %v137_v33 = vld [vmem:[#allocation6 + $0x238] sm:$0xff]  ;;  %v227_v36 = vpack.c.bf16 %v135_v31, %v131_v30  ;;  %v134_v38 = vld [vmem:[#allocation6 + $0x220] sm:$0xff]  ;;  %v132_v39 = vld [vmem:[#allocation6 + $0x210] sm:$0xff] }
  0x3f   :  { %v229_v40 = vpack.c.bf16 %v137_v33, %v133_v32  ;;  %v136_v41 = vld [vmem:[#allocation6 + $0x230] sm:$0xff]  ;;  %v139_v42 = vld [vmem:[#allocation6 + $0x248] sm:$0xff]  ;;  %v141_v44 = vld [vmem:[#allocation6 + $0x258] sm:$0xff]  ;;  %v226_v46 = vpack.c.bf16 %v134_v38, %v130_v37 }
  0x40   :  { %269 = vmatpush1.bf16.msra.mxu0 %v214_v10  ;;  %v143_v43 = vld [vmem:[#allocation6 + $0x268] sm:$0xff]  ;;  %v145_v45 = vld [vmem:[#allocation6 + $0x278] sm:$0xff]  ;;  %v228_v47 = vpack.c.bf16 %v136_v41, %v132_v39  ;;  %v138_v49 = vld [vmem:[#allocation6 + $0x240] sm:$0xff] }
  0x41   :  { %312 = vmatpush1.bf16.msra.mxu1 %v216_v11  ;;  %270 = vmatprep.subr.bf16.mxu0 %v219_v12  ;;  %v231_v48 = vpack.c.bf16 %v143_v43, %v139_v42  ;;  %v142_v50 = vld [vmem:[#allocation6 + $0x260] sm:$0xff]  ;;  %v140_v51 = vld [vmem:[#allocation6 + $0x250] sm:$0xff]  ;;  %v233_v52 = vpack.c.bf16 %v145_v45, %v141_v44  ;;  %v147_v54 = vld [vmem:[#allocation6 + $0x288] sm:$0xff] }
  0x42   :  { %313 = vmatprep.subr.bf16.mxu1 %v221_v16  ;;  %v144_v53 = vld [vmem:[#allocation6 + $0x270] sm:$0xff]  ;;  %v151_v55 = vld [vmem:[#allocation6 + $0x2a8] sm:$0xff]  ;;  %v149_v56 = vld [vmem:[#allocation6 + $0x298] sm:$0xff]  ;;  %v230_v58 = vpack.c.bf16 %v142_v50, %v138_v49 }
  0x43   :  { %v153_v57 = vld [vmem:[#allocation6 + $0x2b8] sm:$0xff]  ;;  %v232_v59 = vpack.c.bf16 %v144_v53, %v140_v51  ;;  %v235_v60 = vpack.c.bf16 %v151_v55, %v147_v54  ;;  %v146_v61 = vld [vmem:[#allocation6 + $0x280] sm:$0xff]  ;;  %v148_v63 = vld [vmem:[#allocation6 + $0x290] sm:$0xff] }
  0x44   :  { %271 = vmatpush1.bf16.msra.mxu0 %v218_v22  ;;  %v150_v62 = vld [vmem:[#allocation6 + $0x2a0] sm:$0xff]  ;;  %v237_v0 = vpack.c.bf16 %v153_v57, %v149_v56  ;;  %v152_v1 = vld [vmem:[#allocation6 + $0x2b0] sm:$0xff]  ;;  %v155_v2 = vld [vmem:[#allocation6 + $0x2c8] sm:$0xff] }
  0x45   :  { %314 = vmatpush1.bf16.msra.mxu1 %v220_v23  ;;  %272 = vmatprep.subr.bf16.mxu0 %v223_v24  ;;  %v159_v3 = vld [vmem:[#allocation6 + $0x2e8] sm:$0xff]  ;;  %v157_v4 = vld [vmem:[#allocation6 + $0x2d8] sm:$0xff]  ;;  %v234_v6 = vpack.c.bf16 %v150_v62, %v146_v61  ;;  %v154_v7 = vld [vmem:[#allocation6 + $0x2c0] sm:$0xff]  ;;  %v236_v8 = vpack.c.bf16 %v152_v1, %v148_v63 }
  0x46   :  { %315 = vmatprep.subr.bf16.mxu1 %v225_v28  ;;  %v161_v5 = vld [vmem:[#allocation6 + $0x2f8] sm:$0xff]  ;;  %v239_v9 = vpack.c.bf16 %v159_v3, %v155_v2  ;;  %v158_v10 = vld [vmem:[#allocation6 + $0x2e0] sm:$0xff]  ;;  %v156_v11 = vld [vmem:[#allocation6 + $0x2d0] sm:$0xff] }
  0x47   :  { %v160_v12 = vld [vmem:[#allocation6 + $0x2f0] sm:$0xff]  ;;  %v241_v13 = vpack.c.bf16 %v161_v5, %v157_v4  ;;  %v163_v14 = vld [vmem:[#allocation6 + $0x308] sm:$0xff]  ;;  %v165_v17 = vld [vmem:[#allocation6 + $0x318] sm:$0xff]  ;;  %v238_v20 = vpack.c.bf16 %v158_v10, %v154_v7 }
  0x48   :  { %273 = vmatpush1.bf16.msra.mxu0 %v222_v34  ;;  %v167_v15 = vld [vmem:[#allocation6 + $0x328] sm:$0xff]  ;;  %v169_v18 = vld [vmem:[#allocation6 + $0x338] sm:$0xff]  ;;  %v240_v22 = vpack.c.bf16 %v160_v12, %v156_v11  ;;  %v162_v24 = vld [vmem:[#allocation6 + $0x300] sm:$0xff] }
  0x49   :  { %316 = vmatpush1.bf16.msra.mxu1 %v224_v35  ;;  %274 = vmatprep.subr.bf16.mxu0 %v227_v36  ;;  %v61_v16 = vld [vmem:[#allocation3 + $0x8] sm:$0xff]  ;;  %v63_v19 = vld [vmem:[#allocation3 + $0x18] sm:$0xff]  ;;  %v243_v23 = vpack.c.bf16 %v167_v15, %v163_v14  ;;  %v166_v25 = vld [vmem:[#allocation6 + $0x320] sm:$0xff]  ;;  %v245_v27 = vpack.c.bf16 %v169_v18, %v165_v17 }
  0x4a   :  { %317 = vmatprep.subr.bf16.mxu1 %v229_v40  ;;  %v65_v21 = vpack.c.bf16 %v63_v19, %v61_v16  ;;  %v164_v26 = vld [vmem:[#allocation6 + $0x310] sm:$0xff]  ;;  %v171_v29 = vld [vmem:[#allocation6 + $0x348] sm:$0xff]  ;;  %v173_v31 = vld [vmem:[#allocation6 + $0x358] sm:$0xff]  ;;  %v242_v33 = vpack.c.bf16 %v166_v25, %v162_v24 }
  0x4b   :  { %v168_v28 = vld [vmem:[#allocation6 + $0x330] sm:$0xff]  ;;  %v175_v30 = vld [vmem:[#allocation6 + $0x368] sm:$0xff]  ;;  %v177_v32 = vld [vmem:[#allocation6 + $0x378] sm:$0xff] }
  0x4c   :  { %275 = vmatpush1.bf16.msra.mxu0 %v226_v46  ;;  %290 = vmatprep.mubr.bf16.mxu0 %v65_v21  ;;  %v244_v34 = vpack.c.bf16 %v168_v28, %v164_v26  ;;  %v247_v35 = vpack.c.bf16 %v175_v30, %v171_v29  ;;  %v170_v36 = vld [vmem:[#allocation6 + $0x340] sm:$0xff]  ;;  %v172_v38 = vld [vmem:[#allocation6 + $0x350] sm:$0xff]  ;;  %v249_v39 = vpack.c.bf16 %v177_v32, %v173_v31  ;;  %v179_v41 = vld [vmem:[#allocation6 + $0x388] sm:$0xff] }
  0x4d   :  { %318 = vmatpush1.bf16.msra.mxu1 %v228_v47  ;;  %276 = vmatprep.subr.bf16.mxu0 %v231_v48  ;;  %v174_v37 = vld [vmem:[#allocation6 + $0x360] sm:$0xff]  ;;  %v176_v40 = vld [vmem:[#allocation6 + $0x370] sm:$0xff]  ;;  %v183_v42 = vld [vmem:[#allocation6 + $0x3a8] sm:$0xff] }
  0x4e   :  { %319 = vmatprep.subr.bf16.mxu1 %v233_v52  ;;  %333 = vmatprep.mubr.bf16.mxu1 %v65_v21  ;;  %v181_v43 = vld [vmem:[#allocation6 + $0x398] sm:$0xff]  ;;  %v246_v45 = vpack.c.bf16 %v174_v37, %v170_v36  ;;  %v248_v46 = vpack.c.bf16 %v176_v40, %v172_v38  ;;  %v251_v47 = vpack.c.bf16 %v183_v42, %v179_v41  ;;  %v178_v48 = vld [vmem:[#allocation6 + $0x380] sm:$0xff]  ;;  %v180_v50 = vld [vmem:[#allocation6 + $0x390] sm:$0xff] }
  0x4f   :  { %v185_v44 = vld [vmem:[#allocation6 + $0x3b8] sm:$0xff]  ;;  %v182_v49 = vld [vmem:[#allocation6 + $0x3a0] sm:$0xff]  ;;  %v184_v52 = vld [vmem:[#allocation6 + $0x3b0] sm:$0xff] }
  0x50   :  { %277 = vmatpush1.bf16.msra.mxu0 %v230_v58  ;;  %v253_v51 = vpack.c.bf16 %v185_v44, %v181_v43  ;;  %v187_v53 = vld [vmem:[#allocation6 + $0x3c8] sm:$0xff]  ;;  %v189_v55 = vld [vmem:[#allocation6 + $0x3d8] sm:$0xff]  ;;  %v250_v57 = vpack.c.bf16 %v182_v49, %v178_v48  ;;  %v252_v58 = vpack.c.bf16 %v184_v52, %v180_v50  ;;  %v190_v61 = vld [vmem:[#allocation6 + $0x3e0] sm:$0xff] }
  0x51   :  { %320 = vmatpush1.bf16.msra.mxu1 %v232_v59  ;;  %278 = vmatprep.subr.bf16.mxu0 %v235_v60  ;;  %v191_v54 = vld [vmem:[#allocation6 + $0x3e8] sm:$0xff]  ;;  %v193_v56 = vld [vmem:[#allocation6 + $0x3f8] sm:$0xff]  ;;  %v186_v60 = vld [vmem:[#allocation6 + $0x3c0] sm:$0xff] }
  0x52   :  { %321 = vmatprep.subr.bf16.mxu1 %v237_v0  ;;  %v255_v59 = vpack.c.bf16 %v191_v54, %v187_v53  ;;  %v257_v62 = vpack.c.bf16 %v193_v56, %v189_v55  ;;  %v188_v63 = vld [vmem:[#allocation6 + $0x3d0] sm:$0xff]  ;;  %v254_v1 = vpack.c.bf16 %v190_v61, %v186_v60  ;;  %v60_v2 = vld [vmem:[#allocation3] sm:$0xff] }
  0x53   :  { %v192_v0 = vld [vmem:[#allocation6 + $0x3f0] sm:$0xff] }
  0x54   :  { %279 = vmatpush1.bf16.msra.mxu0 %v234_v6  ;;  %v62_v3 = vld [vmem:[#allocation3 + $0x10] sm:$0xff]  ;;  %v256_v4 = vpack.c.bf16 %v192_v0, %v188_v63 }
  0x55   :  { %322 = vmatpush1.bf16.msra.mxu1 %v236_v8  ;;  %280 = vmatprep.subr.bf16.mxu0 %v239_v9  ;;  %v64_v5 = vpack.c.bf16 %v62_v3, %v60_v2 }
  0x56   :  { %323 = vmatprep.subr.bf16.mxu1 %v241_v13 }
  0x58   :  { %281 = vmatpush1.bf16.msra.mxu0 %v238_v20 }
  0x59   :  { %324 = vmatpush1.bf16.msra.mxu1 %v240_v22  ;;  %282 = vmatprep.subr.bf16.mxu0 %v243_v23 }
  0x5a   :  { %325 = vmatprep.subr.bf16.mxu1 %v245_v27 }
  0x5c   :  { %283 = vmatpush1.bf16.msra.mxu0 %v242_v33 }
  0x5d   :  { %326 = vmatpush1.bf16.msra.mxu1 %v244_v34  ;;  %284 = vmatprep.subr.bf16.mxu0 %v247_v35 }
  0x5e   :  { %327 = vmatprep.subr.bf16.mxu1 %v249_v39 }
  0x60   :  { %285 = vmatpush1.bf16.msra.mxu0 %v246_v45 }
  0x61   :  { %328 = vmatpush1.bf16.msra.mxu1 %v248_v46  ;;  %286 = vmatprep.subr.bf16.mxu0 %v251_v47 }
  0x62   :  { %329 = vmatprep.subr.bf16.mxu1 %v253_v51 }
  0x64   :  { %287 = vmatpush1.bf16.msra.mxu0 %v250_v57 }
  0x65   :  { %330 = vmatpush1.bf16.msra.mxu1 %v252_v58  ;;  %288 = vmatprep.subr.bf16.mxu0 %v255_v59 }
  0x66   :  { %331 = vmatprep.subr.bf16.mxu1 %v257_v62 }
  0x68   :  { %289 = vmatpush1.bf16.msra.mxu0 %v254_v1 }
  0x69   :  { %332 = vmatpush1.bf16.msra.mxu1 %v256_v4 }
  0x6b   :  { %291 = vmatmul.mubr.bf16.vlgmr.msra.gmra.mrb[0].mxu0 %v64_v5 }
  0x6c   :  { %334 = vmatmul.mubr.bf16.vlgmr.msra.gmra.mrb[0].mxu1 %v64_v5 }
 0x13e   :  { %v292_v6 = vpop.f32.mrb[0].mxu0 }
 0x13f   :  { %371 = vst [vmem:[#allocation8] sm:$0xff] %v292_v6  ;;  %v335_v7 = vpop.f32.mrb[0].mxu1  ;;  %v294_v8 = vpop.f32.mrb[1].mxu0 }
 0x140   :  { %373 = vst [vmem:[#allocation8 + $0x10] sm:$0xff] %v335_v7  ;;  %372 = vst [vmem:[#allocation8 + $0x8] sm:$0xff] %v294_v8  ;;  %v337_v9 = vpop.f32.mrb[1].mxu1  ;;  %v296_v10 = vpop.f32.mrb[2].mxu0 }
 0x141   :  { %374 = vst [vmem:[#allocation8 + $0x18] sm:$0xff] %v337_v9  ;;  %375 = vst [vmem:[#allocation8 + $0x20] sm:$0xff] %v296_v10  ;;  %v339_v11 = vpop.f32.mrb[2].mxu1  ;;  %v298_v12 = vpop.f32.mrb[3].mxu0 }
 0x142   :  { %377 = vst [vmem:[#allocation8 + $0x30] sm:$0xff] %v339_v11  ;;  %376 = vst [vmem:[#allocation8 + $0x28] sm:$0xff] %v298_v12  ;;  %v341_v13 = vpop.f32.mrb[3].mxu1 }
 0x143   :  { %378 = vst [vmem:[#allocation8 + $0x38] sm:$0xff] %v341_v13 }
 0x144   :  { %459 = shalt.err (!%p456_p6)
}
 0x145   :  { %s460_s12 = scalar_lea.hbm %s542_s2, 1024 }
 0x146   :  { %p461_p7 = scmp.ne.s32.totalorder %s542_s2, %s460_s12  ;;  %p464_p8 = scmp.lt.u32.totalorder %s460_s12, %s542_s2 }
 0x148   :  { %p466_p9 = pnand %p464_p8, %p461_p7 }
 0x14a   :  { %469 = shalt.err (!%p466_p9)
}
 0x14b   :  { %390 = dma.vmem_to_hbm [thread:$0]  %s385_s8, 1024, %s542_s2, [#allocation5], %s480_s0, %s480_s0, %s481_s5  }
 0x14c   :  { %474 = dma.done.wait [#allocation5], 1024  }
 0x14d   :  { %475 = vsyncadd [#allocation5], 4294966272 }
 0x14e   :  { %394 = vsyncpa [#allocation4], 1 }
 0x14f   :  { %395 = vsyncpa [#allocation7], 1 }
 0x150   :  { %396 = vsyncpa [#allocation5], 1 }

</bundles_post_ra>
